<compile_context>
chip_gen: v5e
topology: v5e:2x2
jax: 0.10.0
libtpu: 0.0.40
codegen_flags: <defaults>
</compile_context>

<pallas_src>
import functools

import jax
import jax.numpy as jnp
from jax.experimental import pallas as pl
from jax.experimental.pallas import tpu as pltpu

_LANES = 128
_SUBLANES = 8


def _round_up(x: int, m: int) -> int:
    return ((x + m - 1) // m) * m


def _balanced_negative_kernel(pred_ref, labels_ref, sens_ref,
                              sums_ref, counts_ref, *, threshold, num_groups):
    """Per-tile masked partial reduction.

    pred_ref   : (TILE_R, 128)      predictions (native dtype)
    labels_ref : (TILE_R, 128)      criterion labels
    sens_ref   : (G, TILE_R, 128)   group membership (0/1)
    sums_ref   : (1, G, 128)        per-lane partial sums of pred  | Y==0, S==g
    counts_ref : (1, G, 128)        per-lane partial counts of       Y==0, S==g
    """
    pred = pred_ref[...].astype(jnp.float32)
    labels = labels_ref[...].astype(jnp.float32)

    # ThresholdOperator: (x >= threshold) * 1.0 (threshold is static).
    if threshold is not None:
        pred = (pred >= jnp.float32(threshold)).astype(jnp.float32)

    # Negative-label mask (Y == 0), hoisted once per tile and shared per group.
    neg = (labels == 0.0).astype(jnp.float32)       # (TILE_R, 128)
    pred_neg = pred * neg                           # (TILE_R, 128)

    # Static loop over the small group dimension; sublane reduce keeps the
    # output lane-dense (128 lanes); the lane reduction is finished in XLA.
    sums, counts = [], []
    for g in range(num_groups):
        sg = sens_ref[g].astype(jnp.float32)        # (TILE_R, 128)
        sums.append(jnp.sum(sg * pred_neg, axis=0, keepdims=True))
        counts.append(jnp.sum(sg * neg, axis=0, keepdims=True))
    sums_ref[0] = jnp.concatenate(sums, axis=0)     # (G, 128), single store
    counts_ref[0] = jnp.concatenate(counts, axis=0)


def balanced_negative(pred, labels, sensitive, majority_minority_pairs,
                      threshold=None, tile_rows=None):
    """JAX/Pallas equivalent of BalancedNegative.forward."""
    pred = jnp.reshape(jnp.asarray(pred), (-1,))
    labels = jnp.reshape(jnp.asarray(labels), (-1,))
    sensitive = jnp.asarray(sensitive)
    n = pred.shape[0]
    g = sensitive.shape[1]

    # Lane-dense layout: N -> (rows, 128); rows multiple of tile_r (mult. of 8).
    rows_min = _round_up(max(pl.cdiv(n, _LANES), 1), _SUBLANES)
    if tile_rows is None:
        # Double-buffered input working set target (~16 MiB), capped at 2048 rows.
        vmem_budget = 16 * 1024 * 1024
        tile_rows = min(vmem_budget // (2 * (2 + g) * _LANES * 4), 2048)
    tile_r = max(_SUBLANES, (min(int(tile_rows), rows_min) // _SUBLANES) * _SUBLANES)
    rows = _round_up(rows_min, tile_r)
    n_pad = rows * _LANES
    num_tiles = rows // tile_r

    # Pad. Padded rows have sensitive == 0, so they contribute nothing to either
    # sums or counts (labels padded with 1 as an extra safeguard).
    pred_p = jnp.pad(pred, (0, n_pad - n))
    labels_p = jnp.pad(labels, (0, n_pad - n), constant_values=1)
    sens_p = jnp.pad(sensitive, ((0, n_pad - n), (0, 0)))

    pred2 = pred_p.reshape(rows, _LANES)                 # (rows, 128)
    labels2 = labels_p.reshape(rows, _LANES)             # (rows, 128)
    sens3 = sens_p.T.reshape(g, rows, _LANES)            # (G, rows, 128)

    grid_spec = pltpu.PrefetchScalarGridSpec(
        num_scalar_prefetch=0,
        grid=(num_tiles,),
        in_specs=[
            pl.BlockSpec((tile_r, _LANES), lambda i: (i, 0)),
            pl.BlockSpec((tile_r, _LANES), lambda i: (i, 0)),
            pl.BlockSpec((g, tile_r, _LANES), lambda i: (0, i, 0)),
        ],
        out_specs=[
            pl.BlockSpec((1, g, _LANES), lambda i: (i, 0, 0)),
            pl.BlockSpec((1, g, _LANES), lambda i: (i, 0, 0)),
        ],
    )

    sums_p, counts_p = pl.pallas_call(
        functools.partial(_balanced_negative_kernel,
                          threshold=threshold, num_groups=g),
        out_shape=(jax.ShapeDtypeStruct((num_tiles, g, _LANES), jnp.float32),
                   jax.ShapeDtypeStruct((num_tiles, g, _LANES), jnp.float32)),
        grid_spec=grid_spec,
        compiler_params=pltpu.CompilerParams(
            dimension_semantics=("parallel",),
            vmem_limit_bytes=32 * 1024 * 1024,
        ),
    )(pred2, labels2, sens3)

    # Finish the tiny reduction (over tiles and lanes) outside the kernel.
    sums = jnp.sum(sums_p, axis=(0, 2))                  # (G,)
    counts = jnp.sum(counts_p, axis=(0, 2))              # (G,)
    means = sums / counts                                # E[Yhat | Y=0, S=g]

    # Glue: assemble |minority_mean - majority_mean| per (maj, min) pair.
    disparities = []
    for maj_idx, min_groups in majority_minority_pairs:
        for min_idx in min_groups:
            disparities.append(jnp.abs(means[min_idx] - means[maj_idx]))
    return jnp.stack(disparities)


def _reference(pred, labels, sensitive, pairs, threshold=None):
    """Pure-JAX reference mirroring the PyTorch implementation."""
    pred = jnp.reshape(jnp.asarray(pred), (-1,)).astype(jnp.float32)
    labels = jnp.reshape(jnp.asarray(labels), (-1,)).astype(jnp.float32)
    sensitive = jnp.asarray(sensitive).astype(jnp.float32)
    keep = labels == 0.0
    p = pred[keep]
    s = sensitive[keep, :]
    if threshold is not None:
        p = (p >= threshold).astype(jnp.float32)
    out = []
    for maj_idx, min_groups in pairs:
        maj_mean = jnp.sum(p * s[:, maj_idx]) / jnp.sum(s[:, maj_idx])
        for min_idx in min_groups:
            min_mean = jnp.sum(p * s[:, min_idx]) / jnp.sum(s[:, min_idx])
            out.append(jnp.abs(min_mean - maj_mean))
    return jnp.stack(out)


if __name__ == "__main__":
    # --- Case 1: the doctest example (expected disparity ~ 0.0) ---
    sensitive1 = jnp.array([[1, 0], [1, 0], [0, 1], [0, 1]], dtype=jnp.float32)
    pred1 = jnp.array([0.2, 0.8, 1.0, 0.8], dtype=jnp.float32)
    labels1 = jnp.array([1.0, 0.0, 1.0, 0.0], dtype=jnp.float32)
    pairs1 = [(0, [1])]  # majority col 0, minority cols [1]

    out1 = balanced_negative(pred1, labels1, sensitive1, pairs1)
    ref1 = _reference(pred1, labels1, sensitive1, pairs1)
    jax.block_until_ready(out1)

    # --- Case 2: deterministic example (N=256, G=3), with threshold ---
    key = jax.random.PRNGKey(0)
    n, g = 256, 3
    pred2 = jax.random.uniform(key, (n,), dtype=jnp.float32)
    labels2 = (jnp.arange(n) % 2).astype(jnp.float32)        # every group has negatives
    sensitive2 = jax.nn.one_hot(jnp.arange(n) % g, g, dtype=jnp.float32)
    pairs2 = [(0, [1, 2])]

    out2 = balanced_negative(pred2, labels2, sensitive2, pairs2, threshold=0.5)
    ref2 = _reference(pred2, labels2, sensitive2, pairs2, threshold=0.5)
    jax.block_until_ready(out2)

    # --- Case 3: same data, no threshold ---
    out3 = balanced_negative(pred2, labels2, sensitive2, pairs2)
    ref3 = _reference(pred2, labels2, sensitive2, pairs2)
    jax.block_until_ready(out3)

    # --- Case 4: multi-tile grid path (N=4096, G=3, small explicit tile) ---
    n4 = 4096
    pred4 = jax.random.uniform(jax.random.PRNGKey(0), (n4, 1), dtype=jnp.float32)
    labels4 = (jnp.arange(n4) % 2).astype(jnp.float32)
    sensitive4 = jax.nn.one_hot(jnp.arange(n4) % 3, 3, dtype=jnp.float32)
    out4 = balanced_negative(pred4, labels4, sensitive4, pairs2,
                             threshold=0.5, tile_rows=8)
    ref4 = _reference(pred4, labels4, sensitive4, pairs2, threshold=0.5)
    jax.block_until_ready(out4)

    assert out1.shape == (1,) and out2.shape == (2,) and out3.shape == (2,)
    assert out4.shape == (2,)
    assert jnp.allclose(out1, ref1, atol=1e-6), (out1, ref1)
    assert jnp.allclose(out2, ref2, atol=1e-6), (out2, ref2)
    assert jnp.allclose(out3, ref3, atol=1e-6), (out3, ref3)
    assert jnp.allclose(out4, ref4, atol=1e-6), (out4, ref4)

    print("KERNEL_OK")
</pallas_src>

<mosaic_0001>
module attributes {stable_mosaic.version = 11 : i64} {
  func.func @_balanced_negative_kernel(%arg0: i32, %arg1: memref<8x128xf32, #tpu.memory_space<vmem>>, %arg2: memref<8x128xf32, #tpu.memory_space<vmem>>, %arg3: memref<2x8x128xf32, #tpu.memory_space<vmem>>, %arg4: memref<1x2x128xf32, #tpu.memory_space<vmem>>, %arg5: memref<1x2x128xf32, #tpu.memory_space<vmem>>) attributes {dimension_semantics = [#tpu.dimension_semantics<parallel>], iteration_bounds = array<i64: 1>, scalar_prefetch = 0 : i64, scratch_operands = 0 : i64, tpu.core_type = #tpu.core_type<tc>, window_params = [{transform_indices = @transform_0, window_bounds = array<i64: 8, 128>}, {transform_indices = @transform_1, window_bounds = array<i64: 8, 128>}, {transform_indices = @transform_2, window_bounds = array<i64: 2, 8, 128>}, {transform_indices = @transform_3, window_bounds = array<i64: 1, 2, 128>}, {transform_indices = @transform_4, window_bounds = array<i64: 1, 2, 128>}]} {
    %c0 = arith.constant 0 : index
    %c0_0 = arith.constant 0 : index
    %0 = vector.load %arg1[%c0, %c0_0] : memref<8x128xf32, #tpu.memory_space<vmem>>, vector<8x128xf32>
    %c0_1 = arith.constant 0 : index
    %c0_2 = arith.constant 0 : index
    %1 = vector.load %arg2[%c0_1, %c0_2] : memref<8x128xf32, #tpu.memory_space<vmem>>, vector<8x128xf32>
    %cst = arith.constant 0.000000e+00 : f32
    %2 = vector.broadcast %cst : f32 to vector<8x128xf32>
    %3 = arith.cmpf oeq, %1, %2 : vector<8x128xf32>
    %4 = arith.extui %3 : vector<8x128xi1> to vector<8x128xi32>
    %5 = arith.sitofp %4 : vector<8x128xi32> to vector<8x128xf32>
    %6 = arith.mulf %0, %5 : vector<8x128xf32>
    %c0_3 = arith.constant 0 : index
    %c0_4 = arith.constant 0 : index
    %c0_5 = arith.constant 0 : index
    %7 = vector.load %arg3[%c0_3, %c0_4, %c0_5] : memref<2x8x128xf32, #tpu.memory_space<vmem>>, vector<1x8x128xf32>
    %8 = vector.shape_cast %7 : vector<1x8x128xf32> to vector<8x128xf32>
    %9 = arith.mulf %8, %6 : vector<8x128xf32>
    %cst_6 = arith.constant dense<0.000000e+00> : vector<128xf32>
    %10 = vector.multi_reduction <add>, %9, %cst_6 [0] : vector<8x128xf32> to vector<128xf32>
    %11 = vector.shape_cast %10 : vector<128xf32> to vector<1x128xf32>
    %12 = arith.mulf %8, %5 : vector<8x128xf32>
    %cst_7 = arith.constant dense<0.000000e+00> : vector<128xf32>
    %13 = vector.multi_reduction <add>, %12, %cst_7 [0] : vector<8x128xf32> to vector<128xf32>
    %14 = vector.shape_cast %13 : vector<128xf32> to vector<1x128xf32>
    %c1 = arith.constant 1 : index
    %c0_8 = arith.constant 0 : index
    %c0_9 = arith.constant 0 : index
    %15 = vector.load %arg3[%c1, %c0_8, %c0_9] : memref<2x8x128xf32, #tpu.memory_space<vmem>>, vector<1x8x128xf32>
    %16 = vector.shape_cast %15 : vector<1x8x128xf32> to vector<8x128xf32>
    %17 = arith.mulf %16, %6 : vector<8x128xf32>
    %cst_10 = arith.constant dense<0.000000e+00> : vector<128xf32>
    %18 = vector.multi_reduction <add>, %17, %cst_10 [0] : vector<8x128xf32> to vector<128xf32>
    %19 = vector.shape_cast %18 : vector<128xf32> to vector<1x128xf32>
    %20 = arith.mulf %16, %5 : vector<8x128xf32>
    %cst_11 = arith.constant dense<0.000000e+00> : vector<128xf32>
    %21 = vector.multi_reduction <add>, %20, %cst_11 [0] : vector<8x128xf32> to vector<128xf32>
    %22 = vector.shape_cast %21 : vector<128xf32> to vector<1x128xf32>
    %23 = tpu.concatenate %11, %19 in 0 : vector<1x128xf32>, vector<1x128xf32> -> vector<2x128xf32>
    %c0_12 = arith.constant 0 : index
    %c0_13 = arith.constant 0 : index
    %c0_14 = arith.constant 0 : index
    %24 = vector.load %arg4[%c0_12, %c0_13, %c0_14] : memref<1x2x128xf32, #tpu.memory_space<vmem>>, vector<1x2x128xf32>
    %25 = vector.shape_cast %24 : vector<1x2x128xf32> to vector<2x128xf32>
    %26 = vector.shape_cast %23 : vector<2x128xf32> to vector<1x2x128xf32>
    tpu.vector_store %arg4[%c0_12, %c0_13, %c0_14], %26 {strides = array<i32>} : memref<1x2x128xf32, #tpu.memory_space<vmem>>, vector<1x2x128xf32>,
    %27 = tpu.concatenate %14, %22 in 0 : vector<1x128xf32>, vector<1x128xf32> -> vector<2x128xf32>
    %c0_15 = arith.constant 0 : index
    %c0_16 = arith.constant 0 : index
    %c0_17 = arith.constant 0 : index
    %28 = vector.load %arg5[%c0_15, %c0_16, %c0_17] : memref<1x2x128xf32, #tpu.memory_space<vmem>>, vector<1x2x128xf32>
    %29 = vector.shape_cast %28 : vector<1x2x128xf32> to vector<2x128xf32>
    %30 = vector.shape_cast %27 : vector<2x128xf32> to vector<1x2x128xf32>
    tpu.vector_store %arg5[%c0_15, %c0_16, %c0_17], %30 {strides = array<i32>} : memref<1x2x128xf32, #tpu.memory_space<vmem>>, vector<1x2x128xf32>,
    return
  }
  func.func @transform_0(%arg0: i32) -> (i32, i32) {
    %c0_i32 = arith.constant 0 : i32
    %c0_i32_0 = arith.constant 0 : i32
    return %arg0, %c0_i32 : i32, i32
  }
  func.func @transform_1(%arg0: i32) -> (i32, i32) {
    %c0_i32 = arith.constant 0 : i32
    %c0_i32_0 = arith.constant 0 : i32
    return %arg0, %c0_i32 : i32, i32
  }
  func.func @transform_2(%arg0: i32) -> (i32, i32, i32) {
    %c0_i32 = arith.constant 0 : i32
    %c0_i32_0 = arith.constant 0 : i32
    %c0_i32_1 = arith.constant 0 : i32
    return %c0_i32, %arg0, %c0_i32_0 : i32, i32, i32
  }
  func.func @transform_3(%arg0: i32) -> (i32, i32, i32) {
    %c0_i32 = arith.constant 0 : i32
    %c0_i32_0 = arith.constant 0 : i32
    %c0_i32_1 = arith.constant 0 : i32
    return %arg0, %c0_i32, %c0_i32_0 : i32, i32, i32
  }
  func.func @transform_4(%arg0: i32) -> (i32, i32, i32) {
    %c0_i32 = arith.constant 0 : i32
    %c0_i32_0 = arith.constant 0 : i32
    %c0_i32_1 = arith.constant 0 : i32
    return %arg0, %c0_i32, %c0_i32_0 : i32, i32, i32
  }
}

</mosaic_0001>

<bundles_post_ra>
// kernel: tpu_custom_call.1
= control target key start
LH: loop header
LB: loop body
LE: loop exit
PB: predicated region body
PF: predicated region fallthrough
CT: control target
= control target key end

     0   :  { %10 = vsyncpa [#allocation3], 0  ;;  %s324_s0 = inlined_call_operand.hbm [shape: f32[8,128], index: 0, kind: input, shape index: {}]   ;;  %s325_s1 = inlined_call_operand.hbm [shape: f32[8,128], index: 1, kind: input, shape index: {}]   ;;  %s326_s2 = inlined_call_operand.hbm [shape: f32[2,8,128], index: 2, kind: input, shape index: {}]   ;;  %s327_s3 = inlined_call_operand.hbm [shape: f32[1,2,128], index: 3, kind: output, shape index: {0}]   ;;  %s328_s4 = inlined_call_operand.hbm [shape: f32[1,2,128], index: 4, kind: output, shape index: {1}]  }
   0x1   :  { %11 = vsyncpa [#allocation6], 0 }
   0x2   :  { %12 = vsyncpa [#allocation4], 0  ;;  %s30_s17 = sshll.u32 %s325_s1, 4  ;;  %s31_s17 = int_to_ptr.hbm [resolvable:$true] %s30_s17 }
   0x3   :  { %13 = vsyncpa [#allocation10], 0  ;;  %s274_s18 = smov [#allocation5]   ;;  %s19_s22 = sshll.u32 %s324_s0, 4  ;;  %s20_s22 = int_to_ptr.hbm [resolvable:$true] %s19_s22 }
   0x4   :  { %s32_s19 = sshll.u32 %s274_s18, 4  ;;  %s275_s23 = smov [#allocation2]   ;;  %s33_s19 = int_to_ptr.vmem [resolvable:$true] %s32_s19 }
   0x5   :  { %35 = dma.hbm_to_vmem [thread:$0]  %s31_s17, 128, %s33_s19, [#allocation6]  }
   0x6   :  { %s21_s24 = sshll.u32 %s275_s23, 4  ;;  %s40_s27 = sshll.u32 %s326_s2, 4  ;;  %s22_s24 = int_to_ptr.vmem [resolvable:$true] %s21_s24  ;;  %s41_s27 = int_to_ptr.hbm [resolvable:$true] %s40_s27 }
   0x7   :  { %24 = dma.hbm_to_vmem [thread:$0]  %s20_s22, 128, %s22_s24, [#allocation3]  }
   0x8   :  { %s276_s1 = smov [#allocation7]   ;;  %s277_s29 = smov 128  }
   0x9   :  { %s42_s28 = sshll.u32 %s276_s1, 4  ;;  %s278_s30 = smov 8   ;;  %s43_s28 = int_to_ptr.vmem [resolvable:$true] %s42_s28 }
   0xa   :  { %48 = dma.hbm_to_vmem [thread:$0]  %s41_s27, 256, %s43_s28, [#allocation6], %s277_s29, %s277_s29, %s278_s30  }
   0xb   :  { %266 = dma.done.wait [#allocation3], 128  }
   0xc   :  { %267 = vsyncadd [#allocation3], 4294967168 }
   0xd   :  { %268 = dma.done.wait [#allocation6], 384  }
   0xe   :  { %269 = vsyncadd [#allocation6], 4294966912  ;;  %v61_v0 = vld [vmem:[#allocation2] sm:$0xff]  ;;  %v62_v1 = vld [vmem:[#allocation5] sm:$0xff]  ;;  %v279_v4 = vmov 0.0   ;;  %s280_s0 = smov [#allocation9]  }
   0xf   :  { %v67_v2 = vld [vmem:[#allocation7] sm:$0xff]  ;;  %vm63_vm0 = vcmp.eq.f32.partialorder %v62_v1, 0.0  ;;  %v83_v3 = vld [vmem:[#allocation7 + $0x8] sm:$0xff]  ;;  %s119_s2 = sshll.u32 %s280_s0, 4  ;;  %s121_s7 = sshll.u32 %s328_s4, 4  ;;  %vm98_vm1 = vcmask 1040384   ;;  %s120_s2 = int_to_ptr.vmem [resolvable:$true] %s119_s2  ;;  %s122_s7 = int_to_ptr.hbm [resolvable:$true] %s121_s7 }
  0x10   :  { %v137_v5 = vsel %vm63_vm0, 1.0, %v279_v4  ;;  %s281_s8 = smov [#allocation8]   ;;  %s110_s12 = sshll.u32 %s327_s3, 4  ;;  %s111_s12 = int_to_ptr.hbm [resolvable:$true] %s110_s12 }
  0x11   :  { %v66_v6 = vmul.f32 %v137_v5, %v61_v0  ;;  %v75_v7 = vmul.f32 %v137_v5, %v67_v2  ;;  %v91_v8 = vmul.f32 %v137_v5, %v83_v3  ;;  %s108_s9 = sshll.u32 %s281_s8, 4  ;;  %s109_s9 = int_to_ptr.vmem [resolvable:$true] %s108_s9 }
  0x13   :  { %v68_v9 = vmul.f32 %v67_v2, %v66_v6  ;;  %v84_v10 = vmul.f32 %v83_v3, %v66_v6  ;;  %v76_v11 = vrot.slane %v75_v7, 4  ;;  %v92_v12 = vrot.slane %v91_v8, 4 }
  0x15   :  { %v69_v13 = vrot.slane %v68_v9, 4  ;;  %v85_v14 = vrot.slane %v84_v10, 4  ;;  %v77_v15 = vadd.f32 %v76_v11, %v75_v7  ;;  %v93_v16 = vadd.f32 %v92_v12, %v91_v8 }
  0x17   :  { %v70_v17 = vadd.f32 %v69_v13, %v68_v9  ;;  %v86_v18 = vadd.f32 %v85_v14, %v84_v10  ;;  %v78_v19 = vrot.slane %v77_v15, 2  ;;  %v94_v20 = vrot.slane %v93_v16, 2 }
  0x19   :  { %v71_v21 = vrot.slane %v70_v17, 2  ;;  %v87_v22 = vrot.slane %v86_v18, 2  ;;  %v79_v23 = vadd.f32 %v78_v19, %v77_v15  ;;  %v95_v24 = vadd.f32 %v94_v20, %v93_v16 }
  0x1b   :  { %v72_v25 = vadd.f32 %v71_v21, %v70_v17  ;;  %v88_v26 = vadd.f32 %v87_v22, %v86_v18  ;;  %v80_v27 = vrot.slane %v79_v23, 1  ;;  %v96_v28 = vrot.slane %v95_v24, 1 }
  0x1d   :  { %v73_v29 = vrot.slane %v72_v25, 1  ;;  %v89_v30 = vrot.slane %v88_v26, 1  ;;  %v81_v31 = vadd.f32 %v80_v27, %v79_v23  ;;  %v97_v32 = vadd.f32 %v96_v28, %v95_v24 }
  0x1f   :  { %v74_v33 = vadd.f32 %v73_v29, %v72_v25  ;;  %v90_v34 = vadd.f32 %v89_v30, %v88_v26  ;;  %v101_v35 = vsel %vm98_vm1, %v81_v31, %v97_v32 }
  0x20   :  { %102 = vst [vmem:[#allocation9] sm:$0x3] %v101_v35 }
  0x21   :  { %v99_v36 = vsel %vm98_vm1, %v74_v33, %v90_v34  ;;  %124 = dma.vmem_to_hbm [thread:$0]  %s120_s2, 32, %s122_s7, [#allocation10]  }
  0x22   :  { %100 = vst [vmem:[#allocation8] sm:$0x3] %v99_v36 }
  0x23   :  { %113 = dma.vmem_to_hbm [thread:$0]  %s109_s9, 32, %s111_s12, [#allocation4]  }
  0x24   :  { %270 = dma.done.wait [#allocation4], 32  }
  0x25   :  { %271 = vsyncadd [#allocation4], 4294967264 }
  0x26   :  { %272 = dma.done.wait [#allocation10], 32  }
  0x27   :  { %273 = vsyncadd [#allocation10], 4294967264 }
  0x28   :  { %133 = vsyncpa [#allocation3], 1 }
  0x29   :  { %134 = vsyncpa [#allocation6], 1 }
  0x2a   :  { %135 = vsyncpa [#allocation4], 1 }
  0x2b   :  { %136 = vsyncpa [#allocation10], 1 }

</bundles_post_ra>
